<compile_context>
chip_gen: v7x
topology: tpu7x:2x2x1
jax: 0.10.0
libtpu: 0.0.40
codegen_flags: <defaults>
</compile_context>

<pallas_src>
import functools

import jax
import jax.numpy as jnp
import numpy as np
from jax.experimental import pallas as pl
from jax.experimental.pallas import tpu as pltpu

N_BINS = 15
_NSPLIT = 2            # leading 'parallel' grid axis of kernel B (v7x: 2 TCs)
_TN_CAP = 64 * 1024    # hard upper bound on lanes per tile


def _round_up(a, b):
    return ((a + b - 1) // b) * b


def _vmem_capacity_bytes():
    try:
        info = pltpu.get_tpu_info()
        cap = getattr(info, "vmem_capacity_bytes", None)
        if cap:
            return int(cap)
    except Exception:
        pass
    return 64 * 1024 * 1024          # conservative (v7x per-TC VMEM)


def _pick_tile(n, c, logit_bytes, n_bins, vmem_cap):
    """Lanes per batch tile: biggest multiple of 128 fitting a VMEM budget."""
    budget = vmem_cap // 2
    # kernel A footprint/lane: double-buffered logits + labels + stats blocks
    per_tn_a = 2 * (c * logit_bytes + 4 + 2 * 4)
    # kernel B footprint/lane: 3 f32 scratch accumulators + 2x-buffered stats
    per_tn_b = 3 * (n_bins + 1) * 4 + 2 * (2 * 4)
    tn = budget // max(per_tn_a, per_tn_b)
    # don't over-pad small batches: at most ceil(n / NSPLIT) lanes per tile
    tn = min(tn, _TN_CAP, _round_up(-(-n // _NSPLIT), 128))
    tn = max(128, (tn // 128) * 128)
    return int(tn)


def _conf_acc_kernel(logits_ref, labels_ref, stats_ref, *, n):
    """Per-sample max-softmax confidence + correctness, lane-dense [C, TN].

    Writes stats row 0 = confidence, row 1 = correctness; padded lanes are
    zeroed in-kernel (no separate XLA masking pass).
    """
    i = pl.program_id(0)
    lg = logits_ref[...].astype(jnp.float32)                 # [C, TN]
    lb = labels_ref[...]                                     # [1, TN] int32
    c, tn = lg.shape

    m = jnp.max(lg, axis=0, keepdims=True)                   # [1, TN]
    s = jnp.sum(jnp.exp(lg - m), axis=0, keepdims=True)      # [1, TN]
    conf = 1.0 / s                                           # max softmax prob

    cls = jax.lax.broadcasted_iota(jnp.int32, lg.shape, 0)
    pred = jnp.min(jnp.where(lg == m, cls, c), axis=0, keepdims=True)
    acc = (pred == lb).astype(jnp.float32)                   # [1, TN]

    lane = jax.lax.broadcasted_iota(jnp.int32, (1, tn), 1)
    valid = (i * tn + lane) < n                              # mask padded lanes
    stats_ref[...] = jnp.concatenate(
        [jnp.where(valid, conf, 0.0), jnp.where(valid, acc, 0.0)], axis=0)


def _bin_partials_kernel(edges_ref, stats_ref,
                         cnt_out, sconf_out, scorr_out,
                         cnt_ref, sconf_ref, scorr_ref):
    """Per-split cumulative (conf > edge_k) stats; lane-reduce on last step."""
    s = pl.program_id(1)

    @pl.when(s == 0)
    def _init():
        cnt_ref[...] = jnp.zeros_like(cnt_ref)
        sconf_ref[...] = jnp.zeros_like(sconf_ref)
        scorr_ref[...] = jnp.zeros_like(scorr_ref)

    nb1, tn = cnt_ref.shape
    st = stats_ref[...]                                      # [2, TN]
    # Hoisted broadcasts: materialize once per step and reuse (no CSE in JAX).
    conf_b = jnp.broadcast_to(st[0:1, :], (nb1, tn))
    acc_b = jnp.broadcast_to(st[1:2, :], (nb1, tn))
    edges_b = jnp.broadcast_to(edges_ref[...], (nb1, tn))

    gt = (conf_b > edges_b).astype(jnp.float32)              # nested masks
    # TODO(synk): on v5e (single vst slot) packing cnt/scorr into one int32
    # accumulator would cut accumulator stores from 3 to 2; gated on a bundle
    # dump confirming vst is the saturated slot.
    cnt_ref[...] += gt
    sconf_ref[...] += gt * conf_b
    scorr_ref[...] += gt * acc_b

    @pl.when(s == pl.num_programs(1) - 1)
    def _finalize():
        cnt_out[...] = jnp.sum(cnt_ref[...], axis=1, keepdims=True)[None]
        sconf_out[...] = jnp.sum(sconf_ref[...], axis=1, keepdims=True)[None]
        scorr_out[...] = jnp.sum(scorr_ref[...], axis=1, keepdims=True)[None]


@functools.partial(jax.jit, static_argnames=("n_bins", "tile_n"))
def adaptive_ece(logits, labels, n_bins=N_BINS, tile_n=None):
    """Returns ece of shape (1,), matching AdaptiveECELoss.forward."""
    logits = jnp.asarray(logits)          # keep dtype; cast after load in-kernel
    labels = jnp.asarray(labels, jnp.int32)
    n, c = logits.shape

    vmem_cap = _vmem_capacity_bytes()
    vmem_limit = max(32 * 1024 * 1024, int(vmem_cap * 0.75))
    tn = tile_n if tile_n is not None else _pick_tile(
        n, c, logits.dtype.itemsize, n_bins, vmem_cap)
    n_pad = _round_up(n, _NSPLIT * tn)
    steps = n_pad // (_NSPLIT * tn)

    # Lane-dense layout: batch -> lanes, classes -> sublanes.
    # TODO(synk): for C >= 128 a natural (tm, C) layout kernel would avoid this
    # XLA pad+transpose copy of logits; only the tiny-C path is implemented.
    logits_t = jnp.pad(logits, ((0, n_pad - n), (0, 0))).T            # [C, Npad]
    labels_p = jnp.pad(labels, (0, n_pad - n)).reshape(1, n_pad)      # [1, Npad]

    stats = pl.pallas_call(
        functools.partial(_conf_acc_kernel, n=n),
        out_shape=jax.ShapeDtypeStruct((2, n_pad), jnp.float32),
        grid=(n_pad // tn,),
        in_specs=[pl.BlockSpec((c, tn), lambda i: (0, i)),
                  pl.BlockSpec((1, tn), lambda i: (0, i))],
        out_specs=pl.BlockSpec((2, tn), lambda i: (0, i)),
        compiler_params=pltpu.CompilerParams(
            dimension_semantics=("parallel",),
            vmem_limit_bytes=vmem_limit),
    )(logits_t, labels_p)

    # Adaptive equal-count bin edges (histedges_equalN + np.histogram edges).
    # This mirrors the .cpu()/numpy step of the PyTorch module and stays in XLA.
    # TODO(synk): a full jnp.sort is O(N log^2 N); only n_bins+1 order
    # statistics are needed (quantile selection) if huge-N latency matters.
    conf_real = stats[0, :n]
    edges = jnp.interp(jnp.linspace(0.0, float(n), n_bins + 1),
                       jnp.arange(n, dtype=jnp.float32),
                       jnp.sort(conf_real)).astype(jnp.float32)

    nb1 = n_bins + 1
    partials = pl.pallas_call(
        _bin_partials_kernel,
        out_shape=(jax.ShapeDtypeStruct((_NSPLIT, nb1, 1), jnp.float32),) * 3,
        grid=(_NSPLIT, steps),
        in_specs=[pl.BlockSpec((nb1, 1), lambda sp, st: (0, 0)),
                  pl.BlockSpec((2, tn), lambda sp, st: (0, sp * steps + st))],
        out_specs=(pl.BlockSpec((1, nb1, 1), lambda sp, st: (sp, 0, 0)),) * 3,
        scratch_shapes=[pltpu.VMEM((nb1, tn), jnp.float32)] * 3,
        compiler_params=pltpu.CompilerParams(
            dimension_semantics=("parallel", "arbitrary"),
            vmem_limit_bytes=vmem_limit),
    )(edges.reshape(nb1, 1), stats)

    # Tiny cross-split combine + ECE finalize (O(n_bins)) in XLA.
    p_cnt, p_conf, p_corr = partials
    cnt_cum = jnp.sum(p_cnt, axis=0)[:, 0]                   # [n_bins+1]
    sconf_cum = jnp.sum(p_conf, axis=0)[:, 0]
    scorr_cum = jnp.sum(p_corr, axis=0)[:, 0]

    count = cnt_cum[:-1] - cnt_cum[1:]                       # nested masks
    conf_sum = sconf_cum[:-1] - sconf_cum[1:]
    corr_sum = scorr_cum[:-1] - scorr_cum[1:]
    inv_cnt = 1.0 / jnp.maximum(count, 1.0)
    avg_conf = conf_sum * inv_cnt
    acc_in_bin = corr_sum * inv_cnt
    prop = count * (1.0 / n)
    ece = jnp.sum(jnp.where(count > 0.0,
                            jnp.abs(avg_conf - acc_in_bin) * prop, 0.0))
    return ece.reshape(1)


def _reference(logits, labels, n_bins=N_BINS):
    """Numpy reference reproducing AdaptiveECELoss.forward semantics."""
    logits = np.asarray(logits, np.float32)
    labels = np.asarray(labels, np.int64)
    e = np.exp(logits - logits.max(axis=1, keepdims=True))
    sm = e / e.sum(axis=1, keepdims=True)
    conf = sm.max(axis=1)
    pred = sm.argmax(axis=1)
    acc = pred == labels
    npt = conf.shape[0]
    edges = np.interp(np.linspace(0, npt, n_bins + 1),
                      np.arange(npt), np.sort(conf))
    ece = 0.0
    for lo, hi in zip(edges[:-1], edges[1:]):
        in_bin = (conf > np.float32(lo)) & (conf <= np.float32(hi))
        prop = in_bin.mean()
        if prop > 0:
            acc_in = acc[in_bin].astype(np.float32).mean()
            avg_conf = conf[in_bin].mean()
            ece += abs(avg_conf - acc_in) * prop
    return np.float32(ece)


if __name__ == "__main__":
    key = jax.random.PRNGKey(0)
    k1, k2, k3, k4 = jax.random.split(key, 4)

    # Case 1: tiny batch, small class count (single tile per split).
    N1, C1 = 64, 8
    logits1 = jax.random.normal(k1, (N1, C1), dtype=jnp.float32) * 2.0
    labels1 = jax.random.randint(k2, (N1,), 0, C1, dtype=jnp.int32)
    ece1 = jax.block_until_ready(adaptive_ece(logits1, labels1))
    ref1 = _reference(np.asarray(logits1), np.asarray(labels1))
    assert ece1.shape == (1,)
    np.testing.assert_allclose(float(ece1[0]), float(ref1), rtol=1e-5, atol=1e-5)

    # Case 2: multi-step accumulation + padded-lane path (forced small tile).
    N2, C2 = 616, 8
    logits2 = jax.random.normal(k3, (N2, C2), dtype=jnp.float32) * 2.0
    labels2 = jax.random.randint(k4, (N2,), 0, C2, dtype=jnp.int32)
    ece2 = jax.block_until_ready(adaptive_ece(logits2, labels2, tile_n=128))
    ref2 = _reference(np.asarray(logits2), np.asarray(labels2))
    np.testing.assert_allclose(float(ece2[0]), float(ref2), rtol=1e-5, atol=1e-5)

    print("KERNEL_OK")
</pallas_src>

<mosaic_0001>
module attributes {stable_mosaic.version = 11 : i64} {
  func.func @_conf_acc_kernel(%arg0: i32, %arg1: memref<8x128xf32, #tpu.memory_space<vmem>>, %arg2: memref<1x128xi32, #tpu.memory_space<vmem>>, %arg3: memref<2x128xf32, #tpu.memory_space<vmem>>) attributes {dimension_semantics = [#tpu.dimension_semantics<parallel>], iteration_bounds = array<i64: 2>, scalar_prefetch = 0 : i64, scratch_operands = 0 : i64, tpu.core_type = #tpu.core_type<tc>, window_params = [{transform_indices = @transform_0, window_bounds = array<i64: 8, 128>}, {transform_indices = @transform_1, window_bounds = array<i64: 1, 128>}, {transform_indices = @transform_2, window_bounds = array<i64: 2, 128>}]} {
    %c0 = arith.constant 0 : index
    %c0_0 = arith.constant 0 : index
    %0 = vector.load %arg1[%c0, %c0_0] : memref<8x128xf32, #tpu.memory_space<vmem>>, vector<8x128xf32>
    %c0_1 = arith.constant 0 : index
    %c0_2 = arith.constant 0 : index
    %1 = vector.load %arg2[%c0_1, %c0_2] : memref<1x128xi32, #tpu.memory_space<vmem>>, vector<1x128xi32>
    %cst = arith.constant dense<0xFF800000> : vector<128xf32>
    %2 = vector.multi_reduction <maximumf>, %0, %cst [0] : vector<8x128xf32> to vector<128xf32>
    %3 = vector.shape_cast %2 : vector<128xf32> to vector<1x128xf32>
    %4 = vector.broadcast %3 : vector<1x128xf32> to vector<8x128xf32>
    %5 = arith.subf %0, %4 : vector<8x128xf32>
    %6 = math.exp %5 : vector<8x128xf32>
    %cst_3 = arith.constant dense<0.000000e+00> : vector<128xf32>
    %7 = vector.multi_reduction <add>, %6, %cst_3 [0] : vector<8x128xf32> to vector<128xf32>
    %8 = vector.shape_cast %7 : vector<128xf32> to vector<1x128xf32>
    %cst_4 = arith.constant 1.000000e+00 : f32
    %9 = vector.broadcast %cst_4 : f32 to vector<1x128xf32>
    %10 = arith.divf %9, %8 : vector<1x128xf32>
    %11 = tpu.iota {dimensions = array<i32: 0>} : vector<8x128xi32>
    %12 = vector.broadcast %3 : vector<1x128xf32> to vector<8x128xf32>
    %13 = arith.cmpf oeq, %0, %12 : vector<8x128xf32>
    %c8_i32 = arith.constant 8 : i32
    %14 = vector.broadcast %c8_i32 : i32 to vector<8x128xi32>
    %15 = arith.select %13, %11, %14 : vector<8x128xi1>, vector<8x128xi32>
    %cst_5 = arith.constant dense<2147483647> : vector<128xi32>
    %16 = vector.multi_reduction <minsi>, %15, %cst_5 [0] : vector<8x128xi32> to vector<128xi32>
    %17 = vector.shape_cast %16 : vector<128xi32> to vector<1x128xi32>
    %18 = arith.cmpi eq, %17, %1 : vector<1x128xi32>
    %19 = arith.extui %18 : vector<1x128xi1> to vector<1x128xi32>
    %20 = arith.sitofp %19 : vector<1x128xi32> to vector<1x128xf32>
    %21 = tpu.iota {dimensions = array<i32: 1>} : vector<1x128xi32>
    %c128_i32 = arith.constant 128 : i32
    %22 = arith.muli %arg0, %c128_i32 : i32
    %23 = vector.broadcast %22 : i32 to vector<1x128xi32>
    %24 = arith.addi %23, %21 : vector<1x128xi32>
    %c64_i32 = arith.constant 64 : i32
    %25 = vector.broadcast %c64_i32 : i32 to vector<1x128xi32>
    %26 = arith.cmpi slt, %24, %25 : vector<1x128xi32>
    %cst_6 = arith.constant 0.000000e+00 : f32
    %27 = vector.broadcast %cst_6 : f32 to vector<1x128xf32>
    %28 = arith.select %26, %10, %27 : vector<1x128xi1>, vector<1x128xf32>
    %cst_7 = arith.constant 0.000000e+00 : f32
    %29 = vector.broadcast %cst_7 : f32 to vector<1x128xf32>
    %30 = arith.select %26, %20, %29 : vector<1x128xi1>, vector<1x128xf32>
    %31 = tpu.concatenate %28, %30 in 0 : vector<1x128xf32>, vector<1x128xf32> -> vector<2x128xf32>
    %c0_8 = arith.constant 0 : index
    %c0_9 = arith.constant 0 : index
    %32 = vector.load %arg3[%c0_8, %c0_9] : memref<2x128xf32, #tpu.memory_space<vmem>>, vector<2x128xf32>
    tpu.vector_store %arg3[%c0_8, %c0_9], %31 {strides = array<i32>} : memref<2x128xf32, #tpu.memory_space<vmem>>, vector<2x128xf32>,
    return
  }
  func.func @transform_0(%arg0: i32) -> (i32, i32) {
    %c0_i32 = arith.constant 0 : i32
    %c0_i32_0 = arith.constant 0 : i32
    return %c0_i32, %arg0 : i32, i32
  }
  func.func @transform_1(%arg0: i32) -> (i32, i32) {
    %c0_i32 = arith.constant 0 : i32
    %c0_i32_0 = arith.constant 0 : i32
    return %c0_i32, %arg0 : i32, i32
  }
  func.func @transform_2(%arg0: i32) -> (i32, i32) {
    %c0_i32 = arith.constant 0 : i32
    %c0_i32_0 = arith.constant 0 : i32
    return %c0_i32, %arg0 : i32, i32
  }
}

module attributes {stable_mosaic.version = 11 : i64} {
  func.func @_bin_partials_kernel(%arg0: i32, %arg1: i32, %arg2: memref<16x1xf32, #tpu.memory_space<vmem>>, %arg3: memref<2x128xf32, #tpu.memory_space<vmem>>, %arg4: memref<1x16x1xf32, #tpu.memory_space<vmem>>, %arg5: memref<1x16x1xf32, #tpu.memory_space<vmem>>, %arg6: memref<1x16x1xf32, #tpu.memory_space<vmem>>, %arg7: memref<16x128xf32, #tpu.memory_space<vmem>>, %arg8: memref<16x128xf32, #tpu.memory_space<vmem>>, %arg9: memref<16x128xf32, #tpu.memory_space<vmem>>) attributes {dimension_semantics = [#tpu.dimension_semantics<parallel>, #tpu.dimension_semantics<arbitrary>], iteration_bounds = array<i64: 2, 1>, scalar_prefetch = 0 : i64, scratch_operands = 3 : i64, tpu.core_type = #tpu.core_type<tc>, window_params = [{pipeline_mode = #tpu.pipeline_mode<synchronous>, transform_indices = @transform_0, window_bounds = array<i64: 16, 1>}, {transform_indices = @transform_1, window_bounds = array<i64: 2, 128>}, {transform_indices = @transform_2, window_bounds = array<i64: 1, 16, 1>}, {transform_indices = @transform_3, window_bounds = array<i64: 1, 16, 1>}, {transform_indices = @transform_4, window_bounds = array<i64: 1, 16, 1>}]} {
    %c0_i32 = arith.constant 0 : i32
    %0 = arith.cmpi eq, %arg1, %c0_i32 : i32
    %1 = arith.extui %0 : i1 to i32
    %c0_i32_0 = arith.constant 0 : i32
    %2 = arith.cmpi ne, %1, %c0_i32_0 : i32
    scf.if %2 {
      %cst = arith.constant 0.000000e+00 : f32
      %30 = vector.broadcast %cst : f32 to vector<16x128xf32>
      %c0_18 = arith.constant 0 : index
      %c0_19 = arith.constant 0 : index
      %31 = vector.load %arg7[%c0_18, %c0_19] : memref<16x128xf32, #tpu.memory_space<vmem>>, vector<16x128xf32>
      tpu.vector_store %arg7[%c0_18, %c0_19], %30 {strides = array<i32>} : memref<16x128xf32, #tpu.memory_space<vmem>>, vector<16x128xf32>,
      %cst_20 = arith.constant 0.000000e+00 : f32
      %32 = vector.broadcast %cst_20 : f32 to vector<16x128xf32>
      %c0_21 = arith.constant 0 : index
      %c0_22 = arith.constant 0 : index
      %33 = vector.load %arg8[%c0_21, %c0_22] : memref<16x128xf32, #tpu.memory_space<vmem>>, vector<16x128xf32>
      tpu.vector_store %arg8[%c0_21, %c0_22], %32 {strides = array<i32>} : memref<16x128xf32, #tpu.memory_space<vmem>>, vector<16x128xf32>,
      %cst_23 = arith.constant 0.000000e+00 : f32
      %34 = vector.broadcast %cst_23 : f32 to vector<16x128xf32>
      %c0_24 = arith.constant 0 : index
      %c0_25 = arith.constant 0 : index
      %35 = vector.load %arg9[%c0_24, %c0_25] : memref<16x128xf32, #tpu.memory_space<vmem>>, vector<16x128xf32>
      tpu.vector_store %arg9[%c0_24, %c0_25], %34 {strides = array<i32>} : memref<16x128xf32, #tpu.memory_space<vmem>>, vector<16x128xf32>,
    } else {
    }
    %c0 = arith.constant 0 : index
    %c0_1 = arith.constant 0 : index
    %3 = vector.load %arg3[%c0, %c0_1] : memref<2x128xf32, #tpu.memory_space<vmem>>, vector<2x128xf32>
    %4 = vector.extract_strided_slice %3 {offsets = [0, 0], sizes = [1, 128], strides = [1, 1]} : vector<2x128xf32> to vector<1x128xf32>
    %5 = vector.shape_cast %4 : vector<1x128xf32> to vector<1x128xf32>
    %6 = vector.broadcast %5 : vector<1x128xf32> to vector<16x128xf32>
    %7 = vector.extract_strided_slice %3 {offsets = [1, 0], sizes = [1, 128], strides = [1, 1]} : vector<2x128xf32> to vector<1x128xf32>
    %8 = vector.shape_cast %7 : vector<1x128xf32> to vector<1x128xf32>
    %9 = vector.broadcast %8 : vector<1x128xf32> to vector<16x128xf32>
    %c0_2 = arith.constant 0 : index
    %c0_3 = arith.constant 0 : index
    %10 = vector.load %arg2[%c0_2, %c0_3] : memref<16x1xf32, #tpu.memory_space<vmem>>, vector<16x1xf32>
    %11 = vector.shape_cast %10 : vector<16x1xf32> to vector<16x1xf32>
    %12 = vector.broadcast %11 : vector<16x1xf32> to vector<16x128xf32>
    %13 = arith.cmpf ogt, %6, %12 : vector<16x128xf32>
    %14 = arith.extui %13 : vector<16x128xi1> to vector<16x128xi32>
    %15 = arith.sitofp %14 : vector<16x128xi32> to vector<16x128xf32>
    %c0_4 = arith.constant 0 : index
    %c0_5 = arith.constant 0 : index
    %16 = vector.load %arg7[%c0_4, %c0_5] : memref<16x128xf32, #tpu.memory_space<vmem>>, vector<16x128xf32>
    %17 = arith.addf %16, %15 : vector<16x128xf32>
    %c0_6 = arith.constant 0 : index
    %c0_7 = arith.constant 0 : index
    %18 = vector.load %arg7[%c0_6, %c0_7] : memref<16x128xf32, #tpu.memory_space<vmem>>, vector<16x128xf32>
    tpu.vector_store %arg7[%c0_6, %c0_7], %17 {strides = array<i32>} : memref<16x128xf32, #tpu.memory_space<vmem>>, vector<16x128xf32>,
    %c0_8 = arith.constant 0 : index
    %c0_9 = arith.constant 0 : index
    %19 = vector.load %arg8[%c0_8, %c0_9] : memref<16x128xf32, #tpu.memory_space<vmem>>, vector<16x128xf32>
    %20 = arith.mulf %15, %6 : vector<16x128xf32>
    %21 = arith.addf %19, %20 : vector<16x128xf32>
    %c0_10 = arith.constant 0 : index
    %c0_11 = arith.constant 0 : index
    %22 = vector.load %arg8[%c0_10, %c0_11] : memref<16x128xf32, #tpu.memory_space<vmem>>, vector<16x128xf32>
    tpu.vector_store %arg8[%c0_10, %c0_11], %21 {strides = array<i32>} : memref<16x128xf32, #tpu.memory_space<vmem>>, vector<16x128xf32>,
    %c0_12 = arith.constant 0 : index
    %c0_13 = arith.constant 0 : index
    %23 = vector.load %arg9[%c0_12, %c0_13] : memref<16x128xf32, #tpu.memory_space<vmem>>, vector<16x128xf32>
    %24 = arith.mulf %15, %9 : vector<16x128xf32>
    %25 = arith.addf %23, %24 : vector<16x128xf32>
    %c0_14 = arith.constant 0 : index
    %c0_15 = arith.constant 0 : index
    %26 = vector.load %arg9[%c0_14, %c0_15] : memref<16x128xf32, #tpu.memory_space<vmem>>, vector<16x128xf32>
    tpu.vector_store %arg9[%c0_14, %c0_15], %25 {strides = array<i32>} : memref<16x128xf32, #tpu.memory_space<vmem>>, vector<16x128xf32>,
    %c0_i32_16 = arith.constant 0 : i32
    %27 = arith.cmpi eq, %arg1, %c0_i32_16 : i32
    %28 = arith.extui %27 : i1 to i32
    %c0_i32_17 = arith.constant 0 : i32
    %29 = arith.cmpi ne, %28, %c0_i32_17 : i32
    scf.if %29 {
      %c0_18 = arith.constant 0 : index
      %c0_19 = arith.constant 0 : index
      %30 = vector.load %arg7[%c0_18, %c0_19] : memref<16x128xf32, #tpu.memory_space<vmem>>, vector<16x128xf32>
      %cst = arith.constant dense<0.000000e+00> : vector<16xf32>
      %31 = vector.multi_reduction <add>, %30, %cst [1] : vector<16x128xf32> to vector<16xf32>
      %32 = vector.shape_cast %31 : vector<16xf32> to vector<16x1xf32>
      %33 = vector.shape_cast %32 : vector<16x1xf32> to vector<1x16x1xf32>
      %c0_20 = arith.constant 0 : index
      %c0_21 = arith.constant 0 : index
      %c0_22 = arith.constant 0 : index
      %34 = vector.load %arg4[%c0_20, %c0_21, %c0_22] : memref<1x16x1xf32, #tpu.memory_space<vmem>>, vector<1x16x1xf32>
      tpu.vector_store %arg4[%c0_20, %c0_21, %c0_22], %33 {strides = array<i32>} : memref<1x16x1xf32, #tpu.memory_space<vmem>>, vector<1x16x1xf32>,
      %c0_23 = arith.constant 0 : index
      %c0_24 = arith.constant 0 : index
      %35 = vector.load %arg8[%c0_23, %c0_24] : memref<16x128xf32, #tpu.memory_space<vmem>>, vector<16x128xf32>
      %cst_25 = arith.constant dense<0.000000e+00> : vector<16xf32>
      %36 = vector.multi_reduction <add>, %35, %cst_25 [1] : vector<16x128xf32> to vector<16xf32>
      %37 = vector.shape_cast %36 : vector<16xf32> to vector<16x1xf32>
      %38 = vector.shape_cast %37 : vector<16x1xf32> to vector<1x16x1xf32>
      %c0_26 = arith.constant 0 : index
      %c0_27 = arith.constant 0 : index
      %c0_28 = arith.constant 0 : index
      %39 = vector.load %arg5[%c0_26, %c0_27, %c0_28] : memref<1x16x1xf32, #tpu.memory_space<vmem>>, vector<1x16x1xf32>
      tpu.vector_store %arg5[%c0_26, %c0_27, %c0_28], %38 {strides = array<i32>} : memref<1x16x1xf32, #tpu.memory_space<vmem>>, vector<1x16x1xf32>,
      %c0_29 = arith.constant 0 : index
      %c0_30 = arith.constant 0 : index
      %40 = vector.load %arg9[%c0_29, %c0_30] : memref<16x128xf32, #tpu.memory_space<vmem>>, vector<16x128xf32>
      %cst_31 = arith.constant dense<0.000000e+00> : vector<16xf32>
      %41 = vector.multi_reduction <add>, %40, %cst_31 [1] : vector<16x128xf32> to vector<16xf32>
      %42 = vector.shape_cast %41 : vector<16xf32> to vector<16x1xf32>
      %43 = vector.shape_cast %42 : vector<16x1xf32> to vector<1x16x1xf32>
      %c0_32 = arith.constant 0 : index
      %c0_33 = arith.constant 0 : index
      %c0_34 = arith.constant 0 : index
      %44 = vector.load %arg6[%c0_32, %c0_33, %c0_34] : memref<1x16x1xf32, #tpu.memory_space<vmem>>, vector<1x16x1xf32>
      tpu.vector_store %arg6[%c0_32, %c0_33, %c0_34], %43 {strides = array<i32>} : memref<1x16x1xf32, #tpu.memory_space<vmem>>, vector<1x16x1xf32>,
    } else {
    }
    return
  }
  func.func @transform_0(%arg0: i32, %arg1: i32) -> (i32, i32) {
    %c0_i32 = arith.constant 0 : i32
    %c0_i32_0 = arith.constant 0 : i32
    %c0_i32_1 = arith.constant 0 : i32
    return %c0_i32, %c0_i32_0 : i32, i32
  }
  func.func @transform_1(%arg0: i32, %arg1: i32) -> (i32, i32) {
    %c1_i32 = arith.constant 1 : i32
    %0 = arith.muli %arg0, %c1_i32 : i32
    %1 = arith.addi %0, %arg1 : i32
    %c0_i32 = arith.constant 0 : i32
    %c0_i32_0 = arith.constant 0 : i32
    return %c0_i32, %1 : i32, i32
  }
  func.func @transform_2(%arg0: i32, %arg1: i32) -> (i32, i32, i32) {
    %c0_i32 = arith.constant 0 : i32
    %c0_i32_0 = arith.constant 0 : i32
    %c0_i32_1 = arith.constant 0 : i32
    return %arg0, %c0_i32, %c0_i32_0 : i32, i32, i32
  }
  func.func @transform_3(%arg0: i32, %arg1: i32) -> (i32, i32, i32) {
    %c0_i32 = arith.constant 0 : i32
    %c0_i32_0 = arith.constant 0 : i32
    %c0_i32_1 = arith.constant 0 : i32
    return %arg0, %c0_i32, %c0_i32_0 : i32, i32, i32
  }
  func.func @transform_4(%arg0: i32, %arg1: i32) -> (i32, i32, i32) {
    %c0_i32 = arith.constant 0 : i32
    %c0_i32_0 = arith.constant 0 : i32
    %c0_i32_1 = arith.constant 0 : i32
    return %arg0, %c0_i32, %c0_i32_0 : i32, i32, i32
  }
}

</mosaic_0001>

<bundles_post_ra>
// kernel: custom-call.1
= control target key start
LH: loop header
LB: loop body
LE: loop exit
PB: predicated region body
PF: predicated region fallthrough
CT: control target
= control target key end

     0   :  { %s6_s0 = inlined_call_operand.vmem [shape: u32[16], index: 0, kind: output, shape index: {}]  }

// kernel: adaptive_ece.2
= control target key start
LH: loop header
LB: loop body
LE: loop exit
PB: predicated region body
PF: predicated region fallthrough
CT: control target
= control target key end

     0   :  { %s312_s9 = smov 0   ;;  %s342_s0 = inlined_call_operand.vmem [shape: f32[8,256], index: 0, kind: input, shape index: {}]   ;;  %s343_s1 = inlined_call_operand.vmem [shape: s32[1,256], index: 1, kind: input, shape index: {}]   ;;  %s344_s2 = inlined_call_operand.vmem [shape: f32[2,256], index: 2, kind: output, shape index: {}]  }
   0x1 LB: > { %s318_s10 = sadd.s32 4294967295, %s294_s9   ;;  %p268_p0 = scmp.ge.s32.totalorder %s294_s9, 1  ;;  %s294_s9 = sphi %s312_s9, %s12_s9  }
   0x2   : > { %p119_p1 = scmp.lt.s32.totalorder %s294_s9, 3 }
   0x4   : > { %p120_p2 = pnand %p268_p0, %p119_p1 }
   0x5   : > { %p142_p3 = scmp.lt.s32.totalorder (!%p120_p2), %s318_s10, 1  ;;  %v172_v4 = vlaneseq (!%p120_p2)  ;;  %s272_s16 = sshll.u32 (!%p120_p2), %s318_s10, 7  ;;  %v296_v29 = vmov (!%p120_p2), 0.0   ;;  %vm199_vm6 = vcmask (!%p120_p2), 1040384  }
   0x6   : > { %123 = sbr.rel (%p120_p2) target bundleno = 71 (0x47), region = 28  ;;  %v191_v23 = vstv (!%p120_p2), %s272_s16 }
   0x7   : > { %v173_v7 = vshrl.u32 (!%p120_p2), %v172_v4, 7  ;;  %v189_v22 = vand.u32 (!%p120_p2), 127, %v172_v4 }
   0x9   : > { %v192_v28 = vadd.s32 (!%p120_p2), %v191_v23, %v189_v22 }
   0xb   : > { %vm193_vm5 = vcmp.lt.s32.totalorder (!%p120_p2), %v192_v28, 64 }
   0xd   : > { %s324_s11 = scalar_select %p142_p3, %s318_s10, 1 }
   0xf   : > { %s269_s12 = sshll.u32 %s324_s11, 3  ;;  %s148_s19 = scalar_lea.vmem %s343_s1, %s324_s11 }
  0x10   : > { %s145_s15 = scalar_lea.vmem %s342_s0, %s269_s12  ;;  %v154_v24 = vld [vmem:[%s148_s19] sm:$0x1]  ;;  %s270_s20 = sshll.u32 %s324_s11, 1 }
  0x11   : > { %v153_v0 = vld [vmem:[%s145_s15] sm:$0xff]  ;;  %s152_s23 = scalar_lea.vmem %s344_s2, %s270_s20 }
  0x12   : > { %v155_v1 = vrot.slane %v153_v0, 4 }
  0x14   : > { %v156_v2 = vmax.f32 %v153_v0, %v155_v1 }
  0x16   : > { %v157_v3 = vrot.slane %v156_v2, 2 }
  0x18   : > { %v158_v5 = vmax.f32 %v156_v2, %v157_v3 }
  0x1a   : > { %v159_v6 = vrot.slane %v158_v5, 1 }
  0x1c   : > { %v160_v8 = vmax.f32 %v158_v5, %v159_v6 }
  0x1e   : > { %v161_v9 = vsub.f32 %v153_v0, %v160_v8  ;;  %vm174_vm0 = vcmp.eq.f32.partialorder %v153_v0, %v160_v8 }
  0x1f   : > { %v175_v10 = vsel %vm174_vm0, %v173_v7, 8 }
  0x20   : > { %v162_v11 = vmul.f32 1.442695, %v161_v9  ;;  %v176_v12 = vrot.slane %v175_v10, 4 }
  0x22   : > { %284 = vpow2.f32 %v162_v11  ;;  %vm177_vm1 = vcmp.lt.s32.totalorder %v175_v10, %v176_v12 }
  0x23   : > { %v178_v13 = vsel %vm177_vm1, %v175_v10, %v176_v12 }
  0x24   : > { %v179_v14 = vrot.slane %v178_v13, 2 }
  0x26   : > { %vm180_vm2 = vcmp.lt.s32.totalorder %v178_v13, %v179_v14 }
  0x27   : > { %v181_v15 = vsel %vm180_vm2, %v178_v13, %v179_v14 }
  0x28   : > { %v182_v18 = vrot.slane %v181_v15, 1 }
  0x2a   : > { %vm183_vm3 = vcmp.lt.s32.totalorder %v181_v15, %v182_v18 }
  0x2b   : > { %v184_v26 = vsel %vm183_vm3, %v181_v15, %v182_v18 }
  0x2c   : > { %v285_v16 = vpop.eup %284  ;;  %vm185_vm4 = vcmp.eq.s32.totalorder %v184_v26, %v154_v24 }
  0x2d   : > { %v164_v17 = vrot.slane %v285_v16, 4  ;;  %v271_v30 = vsel %vm185_vm4, 1.0, %v296_v29 }
  0x2e   : > { %v195_v31 = vsel %vm193_vm5, %v271_v30, 0.0 }
  0x2f   : > { %v165_v19 = vadd.f32 %v285_v16, %v164_v17  ;;  %v197_v32 = vrot.slane %v195_v31, 7 }
  0x31   : > { %v166_v20 = vrot.slane %v165_v19, 2 }
  0x33   : > { %v167_v21 = vadd.f32 %v166_v20, %v165_v19 }
  0x35   : > { %v168_v25 = vrot.slane %v167_v21, 1 }
  0x37   : > { %v169_v27 = vadd.f32 %v168_v25, %v167_v21 }
  0x39   : > { %286 = vrcp.f32 %v169_v27 }
  0x43   : > { %v287_v33 = vpop.eup %286 }
  0x44   : > { %v194_v34 = vsel %vm193_vm5, %v287_v33, 0.0 }
  0x45   : > { %v200_v35 = vsel %vm199_vm6, %v194_v34, %v197_v32 }
  0x46   : > { %201 = vst [vmem:[%s152_s23] sm:$0x3] %v200_v35 }
  0x47 PF: > { %s12_s9 = sadd.s32 1, %s294_s9  }
  0x48   : > { %p9_p4 = scmp.ge.s32.totalorder %s12_s9, 4  }
  0x4a   :  { %11 = sbr.rel (!%p9_p4) target bundleno = 1 (0x1), region = 61 }

// kernel: adaptive_ece.3
= control target key start
LH: loop header
LB: loop body
LE: loop exit
PB: predicated region body
PF: predicated region fallthrough
CT: control target
= control target key end

     0   :  { %s552_s15 = smov 0   ;;  %s554_s16 = smov 0   ;;  %s597_s0 = inlined_call_operand.vmem [shape: f32[16,1], index: 0, kind: input, shape index: {}]   ;;  %s598_s1 = inlined_call_operand.vmem [shape: f32[2,256], index: 1, kind: input, shape index: {}]   ;;  %s599_s2 = inlined_call_operand.vmem [shape: f32[2,16,1], index: 2, kind: output, shape index: {0}]   ;;  %s600_s3 = inlined_call_operand.vmem [shape: f32[2,16,1], index: 3, kind: output, shape index: {1}]   ;;  %s601_s4 = inlined_call_operand.vmem [shape: f32[2,16,1], index: 4, kind: output, shape index: {2}]  }
   0x1   :  { %s556_s17 = smov 0  }
   0x2 LB: > { %s27_s18 = sadd.s32 1, %s519_s16  ;;  %p459_p0 = scmp.ge.s32.totalorder %s523_s17, 1  ;;  %s523_s17 = sphi %s556_s17, %s15_s17   ;;  %s519_s16 = sphi %s554_s16, %s603_s16   ;;  %s515_s15 = sphi %s552_s15, %s602_s15  }
   0x3   : > { %p29_p1 = scmp.ge.s32.totalorder %s27_s18, 2  ;;  %p182_p2 = scmp.lt.s32.totalorder %s523_s17, 3 }
   0x5   : > { %s605_s18 = smov (%p29_p1, %s27_s18), 0  ;;  %p183_p3 = pnand %p459_p0, %p182_p2 }
   0x6   : > { %v258_v0 = vld [vmem:[%s597_s0] sm:$0xff] (!%p183_p3)  ;;  %v525_v1 = vmov (!%p183_p3), 0   ;;  %v259_v2 = vld [vmem:[%s597_s0 + $0x8] sm:$0xff] (!%p183_p3)  ;;  %p219_p4 = scmp.lt.s32.totalorder (!%p183_p3), %s515_s15, 1  ;;  %v250_v3 = vlaneseq (!%p183_p3)  ;;  %v526_v9 = vmov (!%p183_p3), 0.0   ;;  %vm307_vm2 = vcmask (!%p183_p3), 7168  }
   0x7   : > { %186 = sbr.rel (%p183_p3) target bundleno = 297 (0x129), region = 28  ;;  %500 = vset.pattern.permute.xlu0 (!%p183_p3), %v525_v1 }
   0x8   : > { %262 = vperm.xlu0 (!%p183_p3), %500, %v258_v0   ;;  %v251_v4 = vshrl.u32 (!%p183_p3), %v250_v3, 7 }
   0xa   : > { %v252_v5 = vsub.s32 (!%p183_p3), 0, %v251_v4  ;;  %v256_v13 = vsub.s32 (!%p183_p3), 1, %v251_v4 }
   0xc   : > { %267 = vperm.xlu0 (!%p183_p3), %500, %v259_v2  }
   0xe   : > { %s607_s15 = smov (!%p219_p4, %s515_s15), 1 }
   0xf   : > { %s460_s23 = sshll.u32 %s607_s15, 1  ;;  %s471_s27 = sshll.u32 %s607_s15, 4 }
  0x10   : > { %s222_s26 = scalar_lea.vmem %s598_s1, %s460_s23  ;;  %s228_s30 = scalar_lea.vmem %s599_s2, %s471_s27 }
  0x11   : > { %v249_v6 = vld [vmem:[%s222_s26] sm:$0x3]  ;;  %s233_s7 = scalar_lea.vmem %s600_s3, %s471_s27  ;;  %s238_s10 = scalar_lea.vmem %s601_s4, %s471_s27 }
  0x12   : > { %v253_v7 = vrot.slane %v249_v6, %v252_v5  ;;  %v257_v16 = vrot.slane %v249_v6, %v256_v13 }
  0x87   : > { %v263_v8 = vpop.permute.xlu0 %262 }
  0x88   : > { %vm270_vm0 = vcmp.gt.f32.partialorder %v253_v7, %v263_v8 }
  0x89   : > { %v467_v10 = vsel %vm270_vm0, 1.0, %v526_v9 }
  0x8a   : > { %303 = vadd.xlane.f32.xlu1 %v467_v10  ;;  %v284_v11 = vmul.f32 %v467_v10, %v253_v7  ;;  %v292_v17 = vmul.f32 %v467_v10, %v257_v16 }
  0x8b   : > { %v268_v12 = vpop.permute.xlu0 %267 }
  0x8c   : > { %vm271_vm1 = vcmp.gt.f32.partialorder %v253_v7, %v268_v12  ;;  %312 = vadd.xlane.f32.xlu0 %v284_v11 }
  0x8d   : > { %v468_v14 = vsel %vm271_vm1, 1.0, %v526_v9 }
  0x8e   : > { %305 = vadd.xlane.f32.xlu1 %v468_v14  ;;  %v285_v15 = vmul.f32 %v468_v14, %v253_v7  ;;  %v293_v18 = vmul.f32 %v468_v14, %v257_v16 }
  0x92   : > { %314 = vadd.xlane.f32.xlu1 %v285_v15 }
  0x96   : > { %320 = vadd.xlane.f32.xlu1 %v292_v17 }
  0x9a   : > { %322 = vadd.xlane.f32.xlu1 %v293_v18 }
 0x117   : > { %v304_v19 = vpop.xlane.xlu1 %303 }
 0x118   : > { %308 = vst.msk [vmem:[%s228_s30] sm:$0xff] %vm307_vm2, %v304_v19 }
 0x119   : > { %v313_v20 = vpop.xlane.xlu0 %312 }
 0x11a   : > { %316 = vst.msk [vmem:[%s233_s7] sm:$0xff] %vm307_vm2, %v313_v20 }
 0x11b   : > { %v306_v21 = vpop.xlane.xlu1 %305 }
 0x11c   : > { %309 = vst.msk [vmem:[%s228_s30 + $0x8] sm:$0xff] %vm307_vm2, %v306_v21 }
 0x11f   : > { %v315_v22 = vpop.xlane.xlu1 %314 }
 0x120   : > { %317 = vst.msk [vmem:[%s233_s7 + $0x8] sm:$0xff] %vm307_vm2, %v315_v22 }
 0x123   : > { %v321_v23 = vpop.xlane.xlu1 %320 }
 0x124   : > { %324 = vst.msk [vmem:[%s238_s10] sm:$0xff] %vm307_vm2, %v321_v23 }
 0x127   : > { %v323_v24 = vpop.xlane.xlu1 %322 }
 0x128   : > { %325 = vst.msk [vmem:[%s238_s10 + $0x8] sm:$0xff] %vm307_vm2, %v323_v24 }
 0x129 PF: > { %s15_s17 = sadd.s32 1, %s523_s17   ;;  %s602_s15 = smov %s519_s16 }
 0x12a   : > { %p12_p5 = scmp.ge.s32.totalorder %s15_s17, 4   ;;  %s603_s16 = smov %s605_s18 }
 0x12c   :  { %14 = sbr.rel (!%p12_p5) target bundleno = 2 (0x2), region = 90 }

</bundles_post_ra>
